<compile_context>
chip_gen: v7x
topology: tpu7x:2x2x1
jax: 0.10.0
libtpu: 0.0.40
codegen_flags: <defaults>
</compile_context>

<pallas_src>
import functools

import jax
import jax.numpy as jnp
import numpy as np
from jax.experimental import pallas as pl
from jax.experimental.pallas import tpu as pltpu


def _num_tensorcores():
    """Best-effort TensorCore count (v7x: 2, v5e/v6e: 1). Falls back to 1."""
    try:
        info = pltpu.get_tpu_info()
    except Exception:
        return 1
    for name in ("num_cores", "core_count", "num_tensorcores",
                 "num_tensor_cores", "tensorcore_count"):
        v = getattr(info, name, None)
        if v:
            try:
                return max(1, int(v))
            except Exception:
                pass
    return 1


def conv_relu_kernel(x_ref, w_ref, b_ref, o_ref, *, NB, H, WCo, KH, padding):
    """One grid step = NB images stacked along the sublane (row) axis.

    x_ref: (1, NB*H, W*Cin)    bf16 rows, lane = w*Cin + ci
    w_ref: (W*Cin, KH*W*Cout)  bf16 block-Toeplitz slab (KW taps + Cin + W-pad folded)
    b_ref: (1, W*Cout)         f32 bias tiled per (w, co) lane
    o_ref: (1, NB*H, W*Cout)   f32 lane-dense output rows
    """
    M = NB * H

    # Single MXU matmul per step (f32 accumulation); the KH vertical taps come out
    # as KH lane-aligned column groups.
    y = jnp.dot(x_ref[0], w_ref[...], preferred_element_type=jnp.float32)  # (M, KH*WCo)

    # Value-space epilogue: bias + KH row-shifted taps (roll on the XLU, a handful
    # of compile-time-constant row-equality selects on the VPU), then ONE unmasked
    # full-width store.  No read-modify-write of o_ref, no masked partial stores.
    row = jax.lax.broadcasted_iota(jnp.int32, (M, WCo), 0)   # global stacked row id
    acc = jnp.broadcast_to(b_ref[...], (M, WCo))             # f32 bias init (hoisted)

    for kh in range(KH):                                      # compile-time unrolled
        s = kh - padding                                      # input-row offset of tap
        tap = y[:, kh * WCo:(kh + 1) * WCo]                   # lane-aligned slice
        if s == 0:
            acc = acc + tap
            continue
        # rolled[r] = tap[(r + s) mod M]
        rolled = pltpu.roll(tap, shift=(-s) % M, axis=0)
        # Rows whose source row r+s falls outside their own image: exact zero-padding
        # along H and no cross-image bleed.  The bad-row set is a small compile-time
        # constant (NB * |s| rows), so this is just a few VPU equality ops.
        if s > 0:
            bad = [bi * H + (H - 1 - t) for bi in range(NB) for t in range(s)]
        else:
            bad = [bi * H + t for bi in range(NB) for t in range(-s)]
        invalid = row == bad[0]
        for r in bad[1:]:
            invalid = invalid | (row == r)
        acc = acc + jnp.where(invalid, 0.0, rolled)

    # ReLU + single lane-dense store.
    o_ref[0] = jnp.maximum(acc, 0.0).astype(o_ref.dtype)


def make_conv_block(w_oihw, bias, *, width, padding=1, num_steps=None):
    """Precompute the block-Toeplitz slab + bias row ONCE (hoisted out of the
    per-forward hot path) and return a jittable forward(x_nchw) closure that
    matches PyTorch ConvBlock: Conv2d(k=2*padding+1, stride=1, 'same') + ReLU."""
    Cout, Cin, KH, KW = w_oihw.shape
    assert KH == 2 * padding + 1 and KW == 2 * padding + 1
    W = width
    WCi, WCo = W * Cin, W * Cout

    # Block-Toeplitz slab:
    #   slab[wp*Cin+ci, kh*W*Cout + wo*Cout + co] = w[co, ci, kh, wp - wo + padding]
    #   (0 when the kw tap is out of range -> exact W zero-padding).
    tap = jnp.transpose(w_oihw, (2, 3, 1, 0))                  # (KH, KW, Cin, Cout)
    wp = jnp.arange(W)
    wo = jnp.arange(W)
    kw_idx = wp[:, None] - wo[None, :] + padding               # (W_in, W_out)
    valid = (kw_idx >= 0) & (kw_idx < KW)
    T = tap[:, jnp.clip(kw_idx, 0, KW - 1), :, :]              # (KH, W_in, W_out, Cin, Cout)
    T = T * valid[None, :, :, None, None].astype(tap.dtype)
    T = jnp.transpose(T, (1, 3, 0, 2, 4))                      # (W_in, Cin, KH, W_out, Cout)
    w_slab = T.reshape(WCi, KH * WCo).astype(jnp.bfloat16)     # bf16 MXU operand
    b_row = jnp.tile(bias, W).reshape(1, WCo).astype(jnp.float32)

    def forward(x_nchw):
        N, Cin_x, H, W_x = x_nchw.shape
        assert Cin_x == Cin and W_x == W

        # One grid step per TensorCore (v7x: 2 "parallel" steps of N/2 images);
        # collapses to a single step on single-TC chips (v5e/v6e).
        steps = num_steps if num_steps is not None else _num_tensorcores()
        steps = max(d for d in range(1, min(steps, N) + 1) if N % d == 0)
        NB = N // steps
        M = NB * H

        # Boundary layout glue (single NCHW->NHWC transpose; disappears in an NHWC
        # inter-layer pipeline).  Cast to bf16 in the wrapper so the HBM->VMEM DMA
        # moves half the bytes and the MXU gets bf16 directly.
        x_rows = jnp.transpose(x_nchw, (0, 2, 3, 1)).reshape(steps, M, WCi)
        x_rows = x_rows.astype(jnp.bfloat16)

        kernel = functools.partial(conv_relu_kernel, NB=NB, H=H, WCo=WCo,
                                   KH=KH, padding=padding)

        # Real MXU work of the Toeplitz matmul (not dense-conv FLOPs).
        flops = 2 * N * H * WCi * (KH * WCo)
        bytes_accessed = (N * H * WCi * 2        # bf16 activations
                          + WCi * KH * WCo * 2   # bf16 weight slab
                          + WCo * 4              # f32 bias row
                          + N * H * WCo * 4)     # f32 output

        out = pl.pallas_call(
            kernel,
            out_shape=jax.ShapeDtypeStruct((steps, M, WCo), jnp.float32),
            grid=(steps,),
            in_specs=[
                pl.BlockSpec((1, M, WCi), lambda n: (n, 0, 0)),
                pl.BlockSpec((WCi, KH * WCo), lambda n: (0, 0)),  # resident weights
                pl.BlockSpec((1, WCo), lambda n: (0, 0)),         # resident bias
            ],
            out_specs=pl.BlockSpec((1, M, WCo), lambda n: (n, 0, 0)),
            compiler_params=pltpu.CompilerParams(
                dimension_semantics=("parallel",)),
            cost_estimate=pl.CostEstimate(
                flops=flops, transcendentals=0, bytes_accessed=bytes_accessed),
        )(x_rows, w_slab, b_row)

        # Boundary glue back to the PyTorch NCHW API (drop in an NHWC pipeline).
        out = out.reshape(N, H, W, Cout)
        return jnp.transpose(out, (0, 3, 1, 2))

    return forward


def orthogonal_init(key, shape):
    """Orthogonal init matching nn.init.orthogonal_ semantics (rows of the
    (Cout, Cin*KH*KW)-flattened weight are orthonormal)."""
    rows = shape[0]
    cols = int(np.prod(shape[1:]))
    a = jax.random.normal(key, (max(rows, cols), min(rows, cols)), dtype=jnp.float32)
    q, r = jnp.linalg.qr(a)
    q = q * jnp.sign(jnp.diag(r))
    if rows < cols:
        q = q.T
    return q[:rows, :cols].reshape(shape)


if __name__ == "__main__":
    key = jax.random.PRNGKey(0)
    k_x, k_w = jax.random.split(key)

    N, Cin, Cout, H, W = 2, 4, 8, 16, 16
    KH = KW = 3
    padding = 1

    x = jax.random.normal(k_x, (N, Cin, H, W), dtype=jnp.float32)
    # ConvBlock.layer_init: orthogonal weight (w_scale=1.0), zero bias.
    w = orthogonal_init(k_w, (Cout, Cin, KH, KW)).astype(jnp.float32)
    b = jnp.zeros((Cout,), dtype=jnp.float32)

    # Weight prep hoisted out of the per-forward path; forward is the hot path.
    forward = jax.jit(make_conv_block(w, b, width=W, padding=padding))
    out = jax.block_until_ready(forward(x))
    assert out.shape == (N, Cout, H, W)

    # Tight check vs an XLA conv with the same bf16-rounded MXU operands
    # (kernel uses bf16 inputs with f32 accumulation).
    ref16 = jax.lax.conv_general_dilated(
        x.astype(jnp.bfloat16), w.astype(jnp.bfloat16),
        window_strides=(1, 1),
        padding=((padding, padding), (padding, padding)),
        dimension_numbers=("NCHW", "OIHW", "NCHW"),
        preferred_element_type=jnp.float32)
    ref16 = jnp.maximum(ref16 + b.reshape(1, -1, 1, 1), 0.0)
    assert jnp.allclose(out, ref16, atol=2e-3, rtol=2e-3), "mismatch vs bf16 reference"

    # Loose sanity check vs the full-f32 reference (bf16 input-rounding tolerance).
    ref32 = jax.lax.conv_general_dilated(
        x, w, window_strides=(1, 1),
        padding=((padding, padding), (padding, padding)),
        dimension_numbers=("NCHW", "OIHW", "NCHW"))
    ref32 = jnp.maximum(ref32 + b.reshape(1, -1, 1, 1), 0.0)
    assert jnp.allclose(out, ref32, atol=6e-2, rtol=6e-2), "mismatch vs f32 reference"

    print("KERNEL_OK")
</pallas_src>

<mosaic_0001>
module attributes {stable_mosaic.version = 11 : i64} {
  func.func @conv_relu_kernel(%arg0: i32, %arg1: memref<1x32x64xbf16, #tpu.memory_space<vmem>>, %arg2: memref<64x384xbf16, #tpu.memory_space<vmem>>, %arg3: memref<1x128xf32, #tpu.memory_space<vmem>>, %arg4: memref<1x32x128xf32, #tpu.memory_space<vmem>>) attributes {dimension_semantics = [#tpu.dimension_semantics<parallel>], iteration_bounds = array<i64: 1>, scalar_prefetch = 0 : i64, scratch_operands = 0 : i64, tpu.core_type = #tpu.core_type<tc>, window_params = [{transform_indices = @transform_0, window_bounds = array<i64: 1, 32, 64>}, {pipeline_mode = #tpu.pipeline_mode<synchronous>, transform_indices = @transform_1, window_bounds = array<i64: 64, 384>}, {pipeline_mode = #tpu.pipeline_mode<synchronous>, transform_indices = @transform_2, window_bounds = array<i64: 1, 128>}, {transform_indices = @transform_3, window_bounds = array<i64: 1, 32, 128>}]} {
    %c0 = arith.constant 0 : index
    %c0_0 = arith.constant 0 : index
    %c0_1 = arith.constant 0 : index
    %0 = vector.load %arg1[%c0, %c0_0, %c0_1] : memref<1x32x64xbf16, #tpu.memory_space<vmem>>, vector<1x32x64xbf16>
    %1 = vector.shape_cast %0 : vector<1x32x64xbf16> to vector<32x64xbf16>
    %c0_2 = arith.constant 0 : index
    %c0_3 = arith.constant 0 : index
    %2 = vector.load %arg2[%c0_2, %c0_3] : memref<64x384xbf16, #tpu.memory_space<vmem>>, vector<64x384xbf16>
    %cst = arith.constant dense<0.000000e+00> : vector<32x384xf32>
    %3 = tpu.matmul %1, %2, %cst {dimension_numbers = #tpu.dot_dimension_numbers<[1], [0], [0], [1], [0, 0, 1, 1], [], []>} : vector<32x64xbf16>, vector<64x384xbf16>, vector<32x384xf32> -> vector<32x384xf32>
    %4 = tpu.iota {dimensions = array<i32: 0>} : vector<32x128xi32>
    %c0_4 = arith.constant 0 : index
    %c0_5 = arith.constant 0 : index
    %5 = vector.load %arg3[%c0_4, %c0_5] : memref<1x128xf32, #tpu.memory_space<vmem>>, vector<1x128xf32>
    %6 = vector.shape_cast %5 : vector<1x128xf32> to vector<1x128xf32>
    %7 = vector.broadcast %6 : vector<1x128xf32> to vector<32x128xf32>
    %8 = vector.extract_strided_slice %3 {offsets = [0, 0], sizes = [32, 128], strides = [1, 1]} : vector<32x384xf32> to vector<32x128xf32>
    %c1_i32 = arith.constant 1 : i32
    %9 = tpu.dynamic_rotate %8 by %c1_i32 dim 0 : vector<32x128xf32>, i32 -> vector<32x128xf32>
    %c0_i32 = arith.constant 0 : i32
    %10 = vector.broadcast %c0_i32 : i32 to vector<32x128xi32>
    %11 = arith.cmpi eq, %4, %10 : vector<32x128xi32>
    %c16_i32 = arith.constant 16 : i32
    %12 = vector.broadcast %c16_i32 : i32 to vector<32x128xi32>
    %13 = arith.cmpi eq, %4, %12 : vector<32x128xi32>
    %14 = arith.ori %11, %13 : vector<32x128xi1>
    %cst_6 = arith.constant 0.000000e+00 : f32
    %15 = vector.broadcast %cst_6 : f32 to vector<32x128xf32>
    %16 = arith.select %14, %15, %9 : vector<32x128xi1>, vector<32x128xf32>
    %17 = arith.addf %7, %16 : vector<32x128xf32>
    %18 = vector.extract_strided_slice %3 {offsets = [0, 128], sizes = [32, 128], strides = [1, 1]} : vector<32x384xf32> to vector<32x128xf32>
    %19 = arith.addf %17, %18 : vector<32x128xf32>
    %20 = vector.extract_strided_slice %3 {offsets = [0, 256], sizes = [32, 128], strides = [1, 1]} : vector<32x384xf32> to vector<32x128xf32>
    %c31_i32 = arith.constant 31 : i32
    %21 = tpu.dynamic_rotate %20 by %c31_i32 dim 0 : vector<32x128xf32>, i32 -> vector<32x128xf32>
    %c15_i32 = arith.constant 15 : i32
    %22 = vector.broadcast %c15_i32 : i32 to vector<32x128xi32>
    %23 = arith.cmpi eq, %4, %22 : vector<32x128xi32>
    %c31_i32_7 = arith.constant 31 : i32
    %24 = vector.broadcast %c31_i32_7 : i32 to vector<32x128xi32>
    %25 = arith.cmpi eq, %4, %24 : vector<32x128xi32>
    %26 = arith.ori %23, %25 : vector<32x128xi1>
    %cst_8 = arith.constant 0.000000e+00 : f32
    %27 = vector.broadcast %cst_8 : f32 to vector<32x128xf32>
    %28 = arith.select %26, %27, %21 : vector<32x128xi1>, vector<32x128xf32>
    %29 = arith.addf %19, %28 : vector<32x128xf32>
    %cst_9 = arith.constant 0.000000e+00 : f32
    %30 = vector.broadcast %cst_9 : f32 to vector<32x128xf32>
    %31 = arith.maximumf %29, %30 : vector<32x128xf32>
    %c0_10 = arith.constant 0 : index
    %c0_11 = arith.constant 0 : index
    %c0_12 = arith.constant 0 : index
    %32 = vector.load %arg4[%c0_10, %c0_11, %c0_12] : memref<1x32x128xf32, #tpu.memory_space<vmem>>, vector<1x32x128xf32>
    %33 = vector.shape_cast %32 : vector<1x32x128xf32> to vector<32x128xf32>
    %34 = vector.shape_cast %31 : vector<32x128xf32> to vector<1x32x128xf32>
    tpu.vector_store %arg4[%c0_10, %c0_11, %c0_12], %34 {strides = array<i32>} : memref<1x32x128xf32, #tpu.memory_space<vmem>>, vector<1x32x128xf32>,
    return
  }
  func.func @transform_0(%arg0: i32) -> (i32, i32, i32) {
    %c0_i32 = arith.constant 0 : i32
    %c0_i32_0 = arith.constant 0 : i32
    %c0_i32_1 = arith.constant 0 : i32
    return %arg0, %c0_i32, %c0_i32_0 : i32, i32, i32
  }
  func.func @transform_1(%arg0: i32) -> (i32, i32) {
    %c0_i32 = arith.constant 0 : i32
    %c0_i32_0 = arith.constant 0 : i32
    %c0_i32_1 = arith.constant 0 : i32
    return %c0_i32, %c0_i32_0 : i32, i32
  }
  func.func @transform_2(%arg0: i32) -> (i32, i32) {
    %c0_i32 = arith.constant 0 : i32
    %c0_i32_0 = arith.constant 0 : i32
    %c0_i32_1 = arith.constant 0 : i32
    return %c0_i32, %c0_i32_0 : i32, i32
  }
  func.func @transform_3(%arg0: i32) -> (i32, i32, i32) {
    %c0_i32 = arith.constant 0 : i32
    %c0_i32_0 = arith.constant 0 : i32
    %c0_i32_1 = arith.constant 0 : i32
    return %arg0, %c0_i32, %c0_i32_0 : i32, i32, i32
  }
}

</mosaic_0001>

<bundles_post_ra>
// kernel: forward.1
= control target key start
LH: loop header
LB: loop body
LE: loop exit
PB: predicated region body
PF: predicated region fallthrough
CT: control target
= control target key end

     0   :  { %v360_v1 = vmov 0   ;;  %vm109_vm0 = vcmask 523264   ;;  %v218_v15 = vlaneseq  ;;  %s446_s1 = inlined_call_operand.vmem [shape: bf16[64,384], index: 1, kind: input, shape index: {}]   ;;  %s447_s0 = inlined_call_operand.vmem [shape: bf16[1,32,64], index: 0, kind: input, shape index: {}]   ;;  %s448_s2 = inlined_call_operand.vmem [shape: f32[1,128], index: 2, kind: input, shape index: {}]   ;;  %s449_s3 = inlined_call_operand.vmem [shape: f32[1,32,128], index: 3, kind: output, shape index: {}]  }
   0x1   :  { %v342_v0 = vld [vmem:[%s446_s1 + $0x4] ss:$12 sps:$4 sm:$0xff]   ;;  %148 = vmatprep.mubr.bf16.mxu0 %v360_v1  ;;  %v344_v2 = vld [vmem:[%s446_s1] ss:$12 sps:$4 sm:$0xff]   ;;  %v345_v3 = vld [vmem:[%s446_s1 + $0x8] ss:$12 sps:$4 sm:$0xff]  }
   0x2   :  { %116 = vmatprep.subr.bf16.mxu0 %v342_v0  ;;  %v346_v4 = vld [vmem:[%s446_s1 + $0x1c] ss:$12 sps:$4 sm:$0xff]   ;;  %v348_v5 = vld [vmem:[%s446_s1 + $0x18] ss:$12 sps:$4 sm:$0xff]   ;;  %329 = vmatprep.subr.bf16.mxu1 %v345_v3  ;;  %v349_v6 = vld [vmem:[%s446_s1 + $0x20] ss:$12 sps:$4 sm:$0xff]  }
   0x3   :  { %117 = vmatpush1.bf16.msra.mxu0 %v344_v2  ;;  %330 = vmatpush3.bf16.msra.mxu1 %v345_v3  ;;  %v350_v7 = vld [vmem:[%s446_s1 + $0x34] ss:$12 sps:$4 sm:$0xff]   ;;  %v353_v8 = vld [vmem:[%s446_s1 + $0x38] ss:$12 sps:$4 sm:$0xff]   ;;  %v352_v9 = vld [vmem:[%s446_s1 + $0x30] ss:$12 sps:$4 sm:$0xff]  }
   0x4   :  { %118 = vmatprep.subr.bf16.mxu0 %v346_v4  ;;  %331 = vmatprep.subr.bf16.mxu1 %v349_v6  ;;  %v354_v10 = vld [vmem:[%s446_s1 + $0x4c] ss:$12 sps:$4 sm:$0xff]   ;;  %v357_v11 = vld [vmem:[%s446_s1 + $0x50] ss:$12 sps:$4 sm:$0xff]   ;;  %v358_v12 = vld [vmem:[%s447_s0] sm:$0xff]   ;;  %v219_v16 = vshrl.u32 %v218_v15, 7 }
   0x5   :  { %v356_v13 = vld [vmem:[%s446_s1 + $0x48] ss:$12 sps:$4 sm:$0xff]   ;;  %337 = vmatprep.mubr.msk.bf16.mxu1 %vm109_vm0, %v358_v12  ;;  %v322_v25 = vld [vmem:[%s448_s2] ss:$0 sm:$0xff] }
   0x6   :  { %v359_v14 = vld [vmem:[%s447_s0 + $0x8] sm:$0xff]   ;;  %vm234_vm1 = vcmp.lt.s32.totalorder %v219_v16, 1  ;;  %v220_v21 = vadd.s32 8, %v219_v16  ;;  %vm267_vm2 = vcmp.lt.s32.totalorder %v219_v16, 7  ;;  %v221_v33 = vadd.s32 16, %v219_v16 }
   0x7   :  { %119 = vmatpush1.bf16.msra.mxu0 %v348_v5  ;;  %332 = vmatpush3.bf16.msra.mxu1 %v349_v6  ;;  %v222_v47 = vadd.s32 24, %v219_v16  ;;  %vm239_vm5 = vcmp.eq.s32.totalorder %v219_v16, 0 }
   0x8   :  { %120 = vmatprep.subr.bf16.mxu0 %v350_v7  ;;  %333 = vmatprep.subr.bf16.mxu1 %v353_v8  ;;  %vm273_vm3 = vcmp.eq.s32.totalorder %v220_v21, 15  ;;  %vm245_vm4 = vcmp.eq.s32.totalorder %v221_v33, 16 }
   0x9   :  { %vm279_vm6 = vcmp.eq.s32.totalorder %v222_v47, 31 }
   0xb   :  { %121 = vmatpush1.bf16.msra.mxu0 %v352_v9  ;;  %334 = vmatpush3.bf16.msra.mxu1 %v353_v8 }
   0xc   :  { %122 = vmatprep.subr.bf16.mxu0 %v354_v10  ;;  %335 = vmatprep.subr.bf16.mxu1 %v357_v11 }
   0xf   :  { %123 = vmatpush1.bf16.msra.mxu0 %v356_v13  ;;  %336 = vmatpush3.bf16.msra.mxu1 %v357_v11 }
  0x12   :  { %318 = vmatmul.mubr.msk.bf16.vlgmr.msra.gmra.mrb[0].mxu0 %vm109_vm0, %v358_v12  ;;  %338 = vmatmul.mubr.msk.bf16.vlgmr.msra.gmra.mrb[0].mxu1 %vm109_vm0, %v359_v14 }
  0x13   :  { %158 = vmatprep.mubr.bf16.mxu0 %v360_v1 }
  0x1a   :  { %319 = vmatmul.mubr.msk.bf16.gmra.mrb[4].mxu0 %vm109_vm0, %v359_v14 }
  0xe5   :  { %v150_v17 = vpop.f32.mrb[0].mxu0  ;;  %v339_v20 = vpop.f32.mrb[0].mxu1 }
  0xe6   :  { %v152_v18 = vpop.f32.mrb[1].mxu0  ;;  %v230_v22 = vrot.slane %v150_v17, 7  ;;  %v203_v26 = vpop.f32.mrb[1].mxu1  ;;  %v265_v27 = vrot.slane %v339_v20, 1 }
  0xe7   :  { %v154_v19 = vpop.f32.mrb[2].mxu0  ;;  %v263_v28 = vrot.slane %v203_v26, 1  ;;  %v340_v29 = vpop.f32.mrb[2].mxu1 }
  0xe8   :  { %v231_v23 = vrot.slane %v154_v19, 7  ;;  %v156_v24 = vpop.f32.mrb[3].mxu0  ;;  %v266_v31 = vrot.slane %v340_v29, 1  ;;  %v206_v32 = vpop.f32.mrb[3].mxu1 }
  0xe9   :  { %v264_v35 = vrot.slane %v206_v32, 1 }
  0xea   :  { %v237_v30 = vsel %vm234_vm1, %v230_v22, %v231_v23  ;;  %v268_v36 = vsel %vm267_vm2, %v265_v27, %v266_v31  ;;  %v271_v37 = vsel %vm267_vm2, %v266_v31, %v263_v28 }
  0xeb   :  { %v256_v34 = vadd.f32 %v322_v25, %v237_v30  ;;  %v269_v39 = vsel %vm267_vm2, %v264_v35, %v265_v27  ;;  %v270_v40 = vsel %vm267_vm2, %v263_v28, %v264_v35  ;;  %v287_v63 = vsel %vm279_vm6, 0.0, %v271_v37 }
  0xec   :  { %v285_v42 = vsel %vm273_vm3, 0.0, %v269_v39 }
  0xed   :  { %v260_v38 = vadd.f32 %v256_v34, %v156_v24  ;;  %v160_v41 = vpop.f32.mrb[4].mxu0 }
  0xee   :  { %v232_v43 = vrot.slane %v160_v41, 7  ;;  %v162_v44 = vpop.f32.mrb[5].mxu0 }
  0xef   :  { %v289_v45 = vadd.f32 %v285_v42, %v260_v38  ;;  %v164_v46 = vpop.f32.mrb[6].mxu0 }
  0xf0   :  { %v236_v48 = vsel %vm234_vm1, %v231_v23, %v232_v43  ;;  %v233_v49 = vrot.slane %v164_v46, 7  ;;  %v166_v50 = vpop.f32.mrb[7].mxu0 }
  0xf1   :  { %v293_v51 = vmax.f32 %v289_v45, 0.0  ;;  %v253_v52 = vsel %vm245_vm4, 0.0, %v236_v48 }
  0xf2   :  { %v257_v53 = vadd.f32 %v322_v25, %v253_v52  ;;  %v238_v54 = vsel %vm234_vm1, %v233_v49, %v230_v22  ;;  %v235_v55 = vsel %vm234_vm1, %v232_v43, %v233_v49 }
  0xf3   :  { %297 = vst [vmem:[%s449_s3 + $0x8] sm:$0xff] %v293_v51  ;;  %v251_v56 = vsel %vm239_vm5, 0.0, %v238_v54  ;;  %v258_v57 = vadd.f32 %v322_v25, %v235_v55 }
  0xf4   :  { %v261_v58 = vadd.f32 %v257_v53, %v162_v44  ;;  %v255_v59 = vadd.f32 %v322_v25, %v251_v56 }
  0xf5   :  { %v262_v60 = vadd.f32 %v258_v57, %v166_v50 }
  0xf6   :  { %v290_v61 = vadd.f32 %v268_v36, %v261_v58  ;;  %v259_v62 = vadd.f32 %v255_v59, %v152_v18 }
  0xf7   :  { %v291_v0 = vadd.f32 %v287_v63, %v262_v60 }
  0xf8   :  { %v294_v1 = vmax.f32 %v290_v61, 0.0  ;;  %v288_v2 = vadd.f32 %v270_v40, %v259_v62 }
  0xf9   :  { %v295_v3 = vmax.f32 %v291_v0, 0.0 }
  0xfa   :  { %298 = vst [vmem:[%s449_s3 + $0x10] sm:$0xff] %v294_v1  ;;  %v292_v4 = vmax.f32 %v288_v2, 0.0 }
  0xfb   :  { %299 = vst [vmem:[%s449_s3 + $0x18] sm:$0xff] %v295_v3 }
  0xfc   :  { %296 = vst [vmem:[%s449_s3] sm:$0xff] %v292_v4 }

</bundles_post_ra>
